<compile_context>
chip_gen: v6e
topology: v6e:2x2x1
jax: 0.10.0
libtpu: 0.0.40
codegen_flags: <defaults>
</compile_context>

<pallas_src>
import functools

import jax
import jax.numpy as jnp
from jax import lax
from jax.experimental import pallas as pl
from jax.experimental.pallas import tpu as pltpu


def _mlp_kernel(x_ref, w1T_ref, b1_ref, w2T_ref, b2_ref, oT_ref):
    # x tile arrives in natural (TB, d_in) orientation; cast in-kernel (no wrapper HBM pass).
    x_blk = x_ref[...].astype(w1T_ref.dtype)                     # (TB, d_in)
    # h^T = W1 @ x^T, expressed as a contraction over the shared feature axis (last dim of both):
    # result (d_hid, TB) is lane-dense (batch on lanes), f32 accumulation on the MXU.
    hT = lax.dot_general(
        w1T_ref[...], x_blk,
        dimension_numbers=(((1,), (1,)), ((), ())),
        preferred_element_type=jnp.float32)                      # (16, TB)
    hT = jnp.maximum(hT + b1_ref[...], 0.0)                      # bias (16,1) lane-broadcast + ReLU in f32
    # y^T = W2 @ h^T -> (12, TB), still lane-dense.
    yT = jnp.dot(w2T_ref[...], hT.astype(w2T_ref.dtype),
                 preferred_element_type=jnp.float32)
    oT_ref[...] = (yT + b2_ref[...]).astype(oT_ref.dtype)        # lane-dense store (last dim = TB)


def simple_model_forward(x, w1, b1, w2, b2, *,
                         block_batch=8192,
                         matmul_dtype=jnp.bfloat16,
                         out_dtype=None,
                         out_transposed=False,
                         min_grid_steps=1,
                         vmem_limit_bytes=None):
    """Forward pass of SimpleModel: Linear(10,16) -> ReLU -> Linear(16,12).

    x:  (B, 10); w1: (10, 16) (= torch weight^T), b1: (16,); w2: (16, 12), b2: (12,).
    block_batch:   rows per grid step (rounded to a multiple of 128 and clamped to the batch).
    matmul_dtype:  MXU input dtype (default bf16, f32 accumulation); jnp.float32 or None for
                   exact x.dtype math. x is cast in-kernel, so no extra wrapper HBM pass.
    out_dtype:     output dtype (default x.dtype); bf16 shrinks the dominant output HBM stream.
    out_transposed: if True, return the feature-major (12, B) result and skip the wrapper-side
                   output transpose (use when the surrounding model can consume that layout).
    min_grid_steps: set to 2 on v7x for large B so the "parallel" batch axis lands on both TCs.
    vmem_limit_bytes: override; default auto-sizes from the tile (32 MiB floor).
    """
    B, d_in = x.shape
    d_hid = w1.shape[1]
    d_out = w2.shape[1]

    cdtype = x.dtype if matmul_dtype is None else jnp.dtype(matmul_dtype)
    odtype = x.dtype if out_dtype is None else jnp.dtype(out_dtype)

    # Batch tile: lane-axis multiple of 128, clamped to the (rounded-up) batch so small B does
    # not compute on pure padding; optionally capped so the grid has >= min_grid_steps steps.
    TB = max(128, min(pl.cdiv(block_batch, 128) * 128, pl.cdiv(B, 128) * 128))
    if min_grid_steps > 1:
        TB = min(TB, max(128, pl.cdiv(B, min_grid_steps * 128) * 128))
    B_pad = pl.cdiv(B, TB) * TB

    # Wrapper-side work is now only: (a) zero-pad x rows to B_pad if needed (single fused pad),
    # (b) tiny weight transposes/casts (weights are VMEM-resident across the whole grid).
    x_p = x if B_pad == B else jnp.pad(x, ((0, B_pad - B), (0, 0)))
    w1T = w1.T.astype(cdtype)                            # (16, 10)  -- torch (out, in) layout
    w2T = w2.T.astype(cdtype)                            # (12, 16)
    b1c = b1.reshape(d_hid, 1).astype(jnp.float32)       # hoisted bias broadcast shapes
    b2c = b2.reshape(d_out, 1).astype(jnp.float32)

    in_isz = jnp.dtype(x.dtype).itemsize
    w_isz = jnp.dtype(cdtype).itemsize
    out_isz = jnp.dtype(odtype).itemsize

    # VMEM budget: x tile (TB, d_in) lane-pads to 128 lanes; out tile (d_out, TB) sublane-pads to 16.
    if vmem_limit_bytes is None:
        tile_bytes = (2 * TB * 128 * in_isz          # double-buffered x tiles
                      + 2 * 16 * TB * out_isz        # double-buffered output tiles
                      + 2 * 16 * TB * 4              # f32 h^T / y^T intermediates
                      + 512 * 1024)                  # weights/biases + slack
        vmem_limit_bytes = max(32 * 1024 * 1024, int(1.5 * tile_bytes))

    cost = pl.CostEstimate(
        flops=2 * B_pad * (d_in * d_hid + d_hid * d_out),
        transcendentals=0,
        bytes_accessed=(B_pad * d_in * in_isz
                        + (d_hid * d_in + d_out * d_hid) * w_isz
                        + (d_hid + d_out) * 4
                        + B_pad * d_out * out_isz),
    )

    yT = pl.pallas_call(
        _mlp_kernel,
        out_shape=jax.ShapeDtypeStruct((d_out, B_pad), odtype),
        grid_spec=pltpu.PrefetchScalarGridSpec(
            num_scalar_prefetch=0,
            grid=(B_pad // TB,),
            in_specs=[
                pl.BlockSpec((TB, d_in), lambda i: (i, 0)),        # x: natural-orientation batch tiles
                pl.BlockSpec((d_hid, d_in), lambda i: (0, 0)),     # weights/biases: fetched once, resident
                pl.BlockSpec((d_hid, 1), lambda i: (0, 0)),
                pl.BlockSpec((d_out, d_hid), lambda i: (0, 0)),
                pl.BlockSpec((d_out, 1), lambda i: (0, 0)),
            ],
            out_specs=pl.BlockSpec((d_out, TB), lambda i: (0, i)),  # lane-dense output tile
        ),
        compiler_params=pltpu.CompilerParams(
            dimension_semantics=("parallel",),   # independent batch tiles -> megacore on v7x
            vmem_limit_bytes=vmem_limit_bytes,
        ),
        cost_estimate=cost,
    )(x_p, w1T, b1c, w2T, b2c)

    if out_transposed:
        return yT[:, :B]                                  # feature-major (12, B): no wrapper transpose
    return yT[:, :B].T                                    # standard (B, 12) row-major API


if __name__ == "__main__":
    key = jax.random.PRNGKey(0)
    kx, kw1, kb1, kw2, kb2 = jax.random.split(key, 5)

    B, D_IN, D_HID, D_OUT = 256, 10, 16, 12

    x = jax.random.normal(kx, (B, D_IN), dtype=jnp.float32)
    # Deterministic "Linear" params stored as (in, out) = W^T of the torch layout.
    w1 = jax.random.normal(kw1, (D_IN, D_HID), dtype=jnp.float32) * 0.1
    b1 = jax.random.normal(kb1, (D_HID,), dtype=jnp.float32) * 0.1
    w2 = jax.random.normal(kw2, (D_HID, D_OUT), dtype=jnp.float32) * 0.1
    b2 = jax.random.normal(kb2, (D_OUT,), dtype=jnp.float32) * 0.1

    ref = jnp.maximum(x @ w1 + b1, 0.0) @ w2 + b2

    # Default path: bf16 MXU inputs (cast in-kernel), f32 accumulate, batch tile clamped to B.
    out = simple_model_forward(x, w1, b1, w2, b2)
    out = jax.block_until_ready(out)
    assert out.shape == (B, D_OUT)
    assert jnp.allclose(out, ref, atol=5e-2, rtol=5e-2), "bf16 kernel mismatch vs reference"

    # Exact f32 path (matches the torch module's numerics).
    out_f32 = simple_model_forward(x, w1, b1, w2, b2, matmul_dtype=jnp.float32)
    out_f32 = jax.block_until_ready(out_f32)
    assert jnp.allclose(out_f32, ref, atol=1e-4, rtol=1e-4), "f32 kernel mismatch vs reference"

    # Ragged batch (exercises the pad/clamp path) + feature-major output (no wrapper transpose).
    Bo = 130
    outT = simple_model_forward(x[:Bo], w1, b1, w2, b2,
                                matmul_dtype=jnp.float32, out_transposed=True)
    outT = jax.block_until_ready(outT)
    assert outT.shape == (D_OUT, Bo)
    assert jnp.allclose(outT.T, ref[:Bo], atol=1e-4, rtol=1e-4), "ragged-batch kernel mismatch"

    print("KERNEL_OK")
</pallas_src>

<mosaic_0001>
module attributes {stable_mosaic.version = 11 : i64} {
  func.func @_mlp_kernel(%arg0: i32, %arg1: memref<256x10xf32, #tpu.memory_space<vmem>>, %arg2: memref<16x10xbf16, #tpu.memory_space<vmem>>, %arg3: memref<16x1xf32, #tpu.memory_space<vmem>>, %arg4: memref<12x16xbf16, #tpu.memory_space<vmem>>, %arg5: memref<12x1xf32, #tpu.memory_space<vmem>>, %arg6: memref<12x256xf32, #tpu.memory_space<vmem>>) attributes {dimension_semantics = [#tpu.dimension_semantics<parallel>], iteration_bounds = array<i64: 1>, scalar_prefetch = 0 : i64, scratch_operands = 0 : i64, tpu.core_type = #tpu.core_type<tc>, window_params = [{transform_indices = @transform_0, window_bounds = array<i64: 256, 10>}, {pipeline_mode = #tpu.pipeline_mode<synchronous>, transform_indices = @transform_1, window_bounds = array<i64: 16, 10>}, {pipeline_mode = #tpu.pipeline_mode<synchronous>, transform_indices = @transform_2, window_bounds = array<i64: 16, 1>}, {pipeline_mode = #tpu.pipeline_mode<synchronous>, transform_indices = @transform_3, window_bounds = array<i64: 12, 16>}, {pipeline_mode = #tpu.pipeline_mode<synchronous>, transform_indices = @transform_4, window_bounds = array<i64: 12, 1>}, {transform_indices = @transform_5, window_bounds = array<i64: 12, 256>}]} {
    %c0 = arith.constant 0 : index
    %c0_0 = arith.constant 0 : index
    %0 = vector.load %arg1[%c0, %c0_0] : memref<256x10xf32, #tpu.memory_space<vmem>>, vector<256x10xf32>
    %1 = arith.truncf %0 : vector<256x10xf32> to vector<256x10xbf16>
    %c0_1 = arith.constant 0 : index
    %c0_2 = arith.constant 0 : index
    %2 = vector.load %arg2[%c0_1, %c0_2] : memref<16x10xbf16, #tpu.memory_space<vmem>>, vector<16x10xbf16>
    %cst = arith.constant dense<0.000000e+00> : vector<16x256xf32>
    %3 = tpu.matmul %2, %1, %cst {dimension_numbers = #tpu.dot_dimension_numbers<[1], [1], [0], [0], [0, 0, 1, 0], [], []>} : vector<16x10xbf16>, vector<256x10xbf16>, vector<16x256xf32> -> vector<16x256xf32>
    %c0_3 = arith.constant 0 : index
    %c0_4 = arith.constant 0 : index
    %4 = vector.load %arg3[%c0_3, %c0_4] : memref<16x1xf32, #tpu.memory_space<vmem>>, vector<16x1xf32>
    %5 = vector.broadcast %4 : vector<16x1xf32> to vector<16x256xf32>
    %6 = arith.addf %3, %5 : vector<16x256xf32>
    %cst_5 = arith.constant 0.000000e+00 : f32
    %7 = vector.broadcast %cst_5 : f32 to vector<16x256xf32>
    %8 = arith.maximumf %6, %7 : vector<16x256xf32>
    %c0_6 = arith.constant 0 : index
    %c0_7 = arith.constant 0 : index
    %9 = vector.load %arg4[%c0_6, %c0_7] : memref<12x16xbf16, #tpu.memory_space<vmem>>, vector<12x16xbf16>
    %10 = arith.truncf %8 : vector<16x256xf32> to vector<16x256xbf16>
    %cst_8 = arith.constant dense<0.000000e+00> : vector<12x256xf32>
    %11 = tpu.matmul %9, %10, %cst_8 {dimension_numbers = #tpu.dot_dimension_numbers<[1], [0], [0], [1], [0, 0, 1, 1], [], []>} : vector<12x16xbf16>, vector<16x256xbf16>, vector<12x256xf32> -> vector<12x256xf32>
    %c0_9 = arith.constant 0 : index
    %c0_10 = arith.constant 0 : index
    %12 = vector.load %arg5[%c0_9, %c0_10] : memref<12x1xf32, #tpu.memory_space<vmem>>, vector<12x1xf32>
    %13 = vector.broadcast %12 : vector<12x1xf32> to vector<12x256xf32>
    %14 = arith.addf %11, %13 : vector<12x256xf32>
    %c0_11 = arith.constant 0 : index
    %c0_12 = arith.constant 0 : index
    %15 = vector.load %arg6[%c0_11, %c0_12] : memref<12x256xf32, #tpu.memory_space<vmem>>, vector<12x256xf32>
    tpu.vector_store %arg6[%c0_11, %c0_12], %14 {strides = array<i32>} : memref<12x256xf32, #tpu.memory_space<vmem>>, vector<12x256xf32>,
    return
  }
  func.func @transform_0(%arg0: i32) -> (i32, i32) {
    %c0_i32 = arith.constant 0 : i32
    %c0_i32_0 = arith.constant 0 : i32
    return %arg0, %c0_i32 : i32, i32
  }
  func.func @transform_1(%arg0: i32) -> (i32, i32) {
    %c0_i32 = arith.constant 0 : i32
    %c0_i32_0 = arith.constant 0 : i32
    %c0_i32_1 = arith.constant 0 : i32
    return %c0_i32, %c0_i32_0 : i32, i32
  }
  func.func @transform_2(%arg0: i32) -> (i32, i32) {
    %c0_i32 = arith.constant 0 : i32
    %c0_i32_0 = arith.constant 0 : i32
    %c0_i32_1 = arith.constant 0 : i32
    return %c0_i32, %c0_i32_0 : i32, i32
  }
  func.func @transform_3(%arg0: i32) -> (i32, i32) {
    %c0_i32 = arith.constant 0 : i32
    %c0_i32_0 = arith.constant 0 : i32
    %c0_i32_1 = arith.constant 0 : i32
    return %c0_i32, %c0_i32_0 : i32, i32
  }
  func.func @transform_4(%arg0: i32) -> (i32, i32) {
    %c0_i32 = arith.constant 0 : i32
    %c0_i32_0 = arith.constant 0 : i32
    %c0_i32_1 = arith.constant 0 : i32
    return %c0_i32, %c0_i32_0 : i32, i32
  }
  func.func @transform_5(%arg0: i32) -> (i32, i32) {
    %c0_i32 = arith.constant 0 : i32
    %c0_i32_0 = arith.constant 0 : i32
    return %c0_i32, %arg0 : i32, i32
  }
}

</mosaic_0001>

<bundles_post_ra>
// kernel: tpu_custom_call.1
= control target key start
LH: loop header
LB: loop body
LE: loop exit
PB: predicated region body
PF: predicated region fallthrough
CT: control target
= control target key end

     0   :  { %vm89_vm0 = vcmask 80896   ;;  %v336_v7 = vmov 0   ;;  %s505_s0 = inlined_call_operand.vmem [shape: f32[256,10], index: 0, kind: input, shape index: {}]   ;;  %s506_s1 = inlined_call_operand.vmem [shape: bf16[16,10], index: 1, kind: input, shape index: {}]   ;;  %s507_s2 = inlined_call_operand.vmem [shape: f32[16,1], index: 2, kind: input, shape index: {}]   ;;  %s508_s3 = inlined_call_operand.vmem [shape: bf16[12,16], index: 3, kind: input, shape index: {}]   ;;  %s509_s4 = inlined_call_operand.vmem [shape: f32[12,1], index: 4, kind: input, shape index: {}]   ;;  %s510_s5 = inlined_call_operand.hbm [shape: f32[12,256], index: 5, kind: output, shape index: {}]  }
   0x1   :  { %v52_v0 = vld [vmem:[%s505_s0 + $0xf0] sm:$0xff]  ;;  %v53_v1 = vld [vmem:[%s505_s0 + $0xf8] sm:$0xff]  ;;  %v50_v5 = vld [vmem:[%s505_s0 + $0xe0] sm:$0xff]  ;;  %310 = vset.pattern.permute.xlu0 %v336_v7  ;;  %245 = vmatprep.mubr.bf16.mxu1 %v336_v7 }
   0x2   :  { %v36_v2 = vld [vmem:[%s505_s0 + $0x70] sm:$0xff]  ;;  %v69_v3 = vpack.c.bf16 %v53_v1, %v52_v0  ;;  %v37_v4 = vld [vmem:[%s505_s0 + $0x78] sm:$0xff]  ;;  %v51_v6 = vld [vmem:[%s505_s0 + $0xe8] sm:$0xff]  ;;  %311 = vset.pattern.permute.xlu1 %v336_v7 }
   0x3   :  { %v61_v8 = vpack.c.bf16 %v37_v4, %v36_v2  ;;  %v68_v9 = vpack.c.bf16 %v51_v6, %v50_v5  ;;  %v34_v10 = vld [vmem:[%s505_s0 + $0x60] sm:$0xff]  ;;  %v35_v11 = vld [vmem:[%s505_s0 + $0x68] sm:$0xff]  ;;  %v48_v14 = vld [vmem:[%s505_s0 + $0xd0] sm:$0xff] }
   0x4   :  { %298 = vmatprep.subr.msk.bf16.mxu0 %vm89_vm0, %v69_v3  ;;  %v60_v13 = vpack.c.bf16 %v35_v11, %v34_v10  ;;  %v49_v15 = vld [vmem:[%s505_s0 + $0xd8] sm:$0xff]  ;;  %v32_v18 = vld [vmem:[%s505_s0 + $0x50] sm:$0xff]  ;;  %v312_v20 = vld [vmem:[%s506_s1] sm:$0xff]  }
   0x5   :  { %v115_v12 = vsel %vm89_vm0, %v61_v8, 0  ;;  %v67_v17 = vpack.c.bf16 %v49_v15, %v48_v14  ;;  %v33_v19 = vld [vmem:[%s505_s0 + $0x58] sm:$0xff]  ;;  %v72_v21 = vld [vmem:[%s507_s2] sm:$0xff]  ;;  %296 = vmatprep.mubr.msk.bf16.mxu0 %vm89_vm0, %v312_v20  ;;  %v73_v22 = vld [vmem:[%s507_s2 + $0x8] sm:$0xff] }
   0x6   :  { %281 = vmatpush3.bf16.xpose.msra.mxu0 %v115_v12  ;;  %v112_v16 = vsel %vm89_vm0, %v60_v13, 0  ;;  %76 = vperm.xlu0 %310, %v72_v21  }
   0x7   :  { %299 = vmatprep.subr.msk.bf16.mxu0 %vm89_vm0, %v68_v9 }
   0xe   :  { %283 = vmatpush3.bf16.xpose.msra.mxu0 %v112_v16 }
   0xf   :  { %10 = vsyncpa [#allocation3], 0  ;;  %300 = vmatprep.subr.msk.bf16.mxu0 %vm89_vm0, %v67_v17  ;;  %v59_v23 = vpack.c.bf16 %v33_v19, %v32_v18  ;;  %v46_v24 = vld [vmem:[%s505_s0 + $0xc0] sm:$0xff]  ;;  %v47_v25 = vld [vmem:[%s505_s0 + $0xc8] sm:$0xff]  ;;  %81 = vperm.xlu0 %310, %v73_v22   ;;  %vm209_vm1 = vcmask 130048   ;;  %s337_s13 = smov [#allocation2]  }
  0x10   :  { %v66_v27 = vpack.c.bf16 %v47_v25, %v46_v24  ;;  %v30_v28 = vld [vmem:[%s505_s0 + $0x40] sm:$0xff]  ;;  %v31_v29 = vld [vmem:[%s505_s0 + $0x48] sm:$0xff]  ;;  %v44_v31 = vld [vmem:[%s505_s0 + $0xb0] sm:$0xff]  ;;  %s265_s14 = sshll.u32 %s337_s13, 4  ;;  %s266_s14 = int_to_ptr.vmem [resolvable:$true] %s265_s14 }
  0x11   :  { %v109_v26 = vsel %vm89_vm0, %v59_v23, 0  ;;  %v58_v30 = vpack.c.bf16 %v31_v29, %v30_v28  ;;  %v45_v32 = vld [vmem:[%s505_s0 + $0xb8] sm:$0xff]  ;;  %v28_v35 = vld [vmem:[%s505_s0 + $0x30] sm:$0xff]  ;;  %v42_v38 = vld [vmem:[%s505_s0 + $0xa0] sm:$0xff]  ;;  %p319_p1 = scmp.lt.s32.totalorder %s266_s14, %s266_s14 }
  0x12   :  { %v65_v34 = vpack.c.bf16 %v45_v32, %v44_v31  ;;  %v29_v36 = vld [vmem:[%s505_s0 + $0x38] sm:$0xff]  ;;  %v43_v39 = vld [vmem:[%s505_s0 + $0xa8] sm:$0xff]  ;;  %v26_v42 = vld [vmem:[%s505_s0 + $0x20] sm:$0xff] }
  0x13   :  { %v106_v33 = vsel %vm89_vm0, %v58_v30, 0  ;;  %v57_v37 = vpack.c.bf16 %v29_v36, %v28_v35  ;;  %v64_v41 = vpack.c.bf16 %v43_v39, %v42_v38  ;;  %v27_v43 = vld [vmem:[%s505_s0 + $0x28] sm:$0xff]  ;;  %v40_v45 = vld [vmem:[%s505_s0 + $0x90] sm:$0xff]  ;;  %v41_v46 = vld [vmem:[%s505_s0 + $0x98] sm:$0xff] }
  0x14   :  { %v56_v44 = vpack.c.bf16 %v27_v43, %v26_v42  ;;  %v63_v48 = vpack.c.bf16 %v41_v46, %v40_v45  ;;  %v24_v49 = vld [vmem:[%s505_s0 + $0x10] sm:$0xff]  ;;  %v25_v50 = vld [vmem:[%s505_s0 + $0x18] sm:$0xff]  ;;  %v38_v52 = vld [vmem:[%s505_s0 + $0x80] sm:$0xff] }
  0x15   :  { %v103_v40 = vsel %vm89_vm0, %v57_v37, 0  ;;  %v55_v51 = vpack.c.bf16 %v25_v50, %v24_v49  ;;  %v39_v53 = vld [vmem:[%s505_s0 + $0x88] sm:$0xff]  ;;  %v22_v56 = vld [vmem:[%s505_s0] sm:$0xff] }
  0x16   :  { %285 = vmatpush3.bf16.xpose.msra.mxu0 %v109_v26  ;;  %v100_v47 = vsel %vm89_vm0, %v56_v44, 0  ;;  %v62_v55 = vpack.c.bf16 %v39_v53, %v38_v52  ;;  %v23_v57 = vld [vmem:[%s505_s0 + $0x8] sm:$0xff]  ;;  %v192_v60 = vld [vmem:[%s509_s4] sm:$0xff] }
  0x17   :  { %301 = vmatprep.subr.msk.bf16.mxu0 %vm89_vm0, %v66_v27  ;;  %v97_v54 = vsel %vm89_vm0, %v55_v51, 0  ;;  %v54_v58 = vpack.c.bf16 %v23_v57, %v22_v56  ;;  %196 = vperm.xlu1 %311, %v192_v60   ;;  %v193_v61 = vld [vmem:[%s509_s4 + $0x8] sm:$0xf]  ;;  %v313_v14 = vld [vmem:[%s508_s3] sm:$0x3f]   ;;  %s314_s3 = scalar_lea.vmem %s266_s14, 512 }
  0x18   :  { %p315_p0 = scmp.ne.s32.totalorder %s266_s14, %s314_s3  ;;  %p320_p2 = scmp.lt.s32.totalorder %s314_s3, %s314_s3 }
  0x19   :  { %v94_v59 = vsel %vm89_vm0, %v54_v58, 0 }
  0x1a   :  { %p321_p3 = por %p320_p2, %p319_p1 }
  0x1b   :  { %201 = vperm.xlu1 %311, %v193_v61  }
  0x1c   :  { %p322_p4 = pnand %p321_p3, %p315_p0 }
  0x1e   :  { %287 = vmatpush3.bf16.xpose.msra.mxu0 %v106_v33 }
  0x1f   :  { %302 = vmatprep.subr.msk.bf16.mxu0 %vm89_vm0, %v65_v34 }
  0x26   :  { %289 = vmatpush3.bf16.xpose.msra.mxu0 %v103_v40 }
  0x27   :  { %303 = vmatprep.subr.msk.bf16.mxu0 %vm89_vm0, %v64_v41 }
  0x2e   :  { %291 = vmatpush3.bf16.xpose.msra.mxu0 %v100_v47 }
  0x2f   :  { %304 = vmatprep.subr.msk.bf16.mxu0 %vm89_vm0, %v63_v48 }
  0x36   :  { %293 = vmatpush3.bf16.xpose.msra.mxu0 %v97_v54 }
  0x37   :  { %305 = vmatprep.subr.msk.bf16.mxu0 %vm89_vm0, %v62_v55 }
  0x3e   :  { %295 = vmatpush3.bf16.xpose.msra.mxu0 %v94_v59 }
  0x45   :  { %297 = vmatmul.mubr.msk.bf16.vlgmr.msra.gmra.mxu0 %vm89_vm0, %v312_v20 }
  0x81   :  { %v77_v62 = vpop.permute.xlu0 %76 }
  0x8a   :  { %v82_v1 = vpop.permute.xlu0 %81 }
  0x92   :  { %v197_v15 = vpop.permute.xlu1 %196 }
  0x96   :  { %v202_v20 = vpop.permute.xlu1 %201 }
 0x105   :  { %v175_v63 = vpop.f32.mrf.mxu0 }
 0x106   :  { %v176_v5 = vadd.f32 %v175_v63, %v77_v62 }
 0x107   :  { %v177_v0 = vpop.f32.mrf.mxu0 }
 0x108   :  { %v178_v3 = vadd.f32 %v177_v0, %v77_v62  ;;  %v184_v11 = vmax.f32 %v176_v5, 0.0 }
 0x109   :  { %v179_v2 = vpop.f32.mrf.mxu0 }
 0x10a   :  { %v180_v4 = vadd.f32 %v179_v2, %v82_v1  ;;  %v185_v9 = vmax.f32 %v178_v3, 0.0 }
 0x10b   :  { %v181_v6 = vpop.f32.mrf.mxu0 }
 0x10c   :  { %v182_v7 = vadd.f32 %v181_v6, %v82_v1  ;;  %v186_v8 = vmax.f32 %v180_v4, 0.0 }
 0x10e   :  { %v187_v10 = vmax.f32 %v182_v7, 0.0  ;;  %v190_v13 = vpack.c.bf16 %v186_v8, %v184_v11 }
 0x110   :  { %v191_v12 = vpack.c.bf16 %v187_v10, %v185_v9 }
 0x112   :  { %227 = vmatprep.subr.bf16.mxu1 %v191_v12 }
 0x113   :  { %228 = vmatpush1.bf16.msra.mxu1 %v190_v13 }
 0x116   :  { %279 = vmatmul.mubr.msk.bf16.vlgmr.msra.gmra.mxu1 %vm209_vm1, %v313_v14 }
 0x1d6   :  { %v247_v16 = vpop.f32.mrf.mxu1 }
 0x1d7   :  { %v248_v17 = vadd.f32 %v247_v16, %v197_v15 }
 0x1d8   :  { %v249_v18 = vpop.f32.mrf.mxu1 }
 0x1d9   :  { %256 = vst [vmem:[#allocation2] sm:$0xff] %v248_v17  ;;  %v250_v19 = vadd.f32 %v249_v18, %v197_v15 }
 0x1da   :  { %v251_v21 = vpop.f32.mrf.mxu1 }
 0x1db   :  { %257 = vst [vmem:[#allocation2 + $0x8] sm:$0xff] %v250_v19  ;;  %v252_v22 = vadd.f32 %v251_v21, %v202_v20 }
 0x1dc   :  { %v253_v23 = vpop.f32.mrf.mxu1 }
 0x1dd   :  { %258 = vst [vmem:[#allocation2 + $0x10] sm:$0xf] %v252_v22  ;;  %v254_v24 = vadd.f32 %v253_v23, %v202_v20 }
 0x1df   :  { %259 = vst [vmem:[#allocation2 + $0x18] sm:$0xf] %v254_v24 }
 0x1e0   :  { %325 = shalt.err (!%p322_p4)
}
 0x1e1   :  { %s338_s15 = smov 256   ;;  %s339_s16 = smov 16  }
 0x1e2   :  { %271 = dma.vmem_to_hbm [thread:$0]  %s266_s14, 512, %s510_s5, [#allocation3], %s338_s15, %s338_s15, %s339_s16  }
 0x1e3   :  { %334 = dma.done.wait [#allocation3], 512  }
 0x1e4   :  { %335 = vsyncadd [#allocation3], 4294966784 }
 0x1e5   :  { %275 = vsyncpa [#allocation3], 1 }

</bundles_post_ra>
